<compile_context>
chip_gen: v7x
topology: tpu7x:2x2x1
jax: 0.10.0
libtpu: 0.0.40
codegen_flags: <defaults>
</compile_context>

<pallas_src>
import functools

import jax
import jax.numpy as jnp
from jax import lax
from jax.experimental import pallas as pl
from jax.experimental.pallas import tpu as pltpu

KERNEL_SIZE = 3   # fixed by the module: nn.Conv1d(..., kernel_size=3, stride=1, padding=1, bias=False)
SUB_ROWS = 32     # batch rows per in-kernel compute chunk (bounds vreg live ranges)


def _round_up(v, m):
    return -(-v // m) * m


def conv1d_same_kernel(x_ref, w_ref, o_ref):
    """'same' Conv1d (k=3, stride=1, pad=1, no bias) on one batch tile, CNL layout.

    x_ref: (C_in,  tn, L)   VMEM  (batch rows on sublanes, length dense on lanes)
    w_ref: (C_out*C_in*3,)  SMEM  (flattened PyTorch weight (C_out, C_in, 3))
    o_ref: (C_out, tn, L)   VMEM
    """
    c_in, tn, length = x_ref.shape
    c_out = o_ref.shape[0]

    # Boundary masks for the zero 'same' padding.  Built once at (1, L) (~2 vregs) and
    # broadcast inside jnp.where, instead of pinning (tn, L) masks for the whole kernel.
    lane = lax.broadcasted_iota(jnp.int32, (1, length), 1)
    not_first = lane > 0
    not_last = lane < (length - 1)

    def compute_rows(r0, rows):
        # co-outer / ci-inner: only ONE (rows, L) accumulator is live at a time; the shifted
        # views are rebuilt per output channel (cheap: VMEM re-load + XLU roll + VPU select).
        for co in range(c_out):
            acc = jnp.zeros((rows, length), jnp.float32)
            for ci in range(c_in):
                xc = x_ref[ci, pl.ds(r0, rows), :].astype(jnp.float32)            # (rows, L)
                # roll goes to the XLU slot; edge zeroing is a cheap VPU select.
                x_m1 = jnp.where(not_first, pltpu.roll(xc, 1, axis=1), 0.0)           # x[l-1]
                x_p1 = jnp.where(not_last, pltpu.roll(xc, length - 1, axis=1), 0.0)   # x[l+1]
                base = (co * c_in + ci) * KERNEL_SIZE
                acc = acc + (w_ref[base + 0] * x_m1
                             + w_ref[base + 1] * xc
                             + w_ref[base + 2] * x_p1)
            o_ref[co, pl.ds(r0, rows), :] = acc.astype(o_ref.dtype)

    # Walk the batch tile in SUB_ROWS-row chunks so live vregs stay well inside the 64-vreg
    # file even for multi-MB tiles.
    sub = min(SUB_ROWS, tn)
    n_full = tn // sub
    rem = tn - n_full * sub

    if n_full == 1:
        compute_rows(0, sub)
    else:
        @pl.loop(0, n_full, unroll=(n_full <= 16))
        def _(c):
            compute_rows(pl.multiple_of(c * sub, sub), sub)

    if rem:  # static tail (only when the whole batch fits in a single small tile)
        compute_rows(n_full * sub, rem)


def _choose_batch_tile(n, block_n, c_in, c_out, length):
    lanes = _round_up(length, 128)
    # Per-row bytes of the double-buffered input + output VMEM tiles.
    bytes_per_row = (c_in + c_out) * lanes * 4 * 2
    vmem_cap_rows = max(8, (16 * 1024 * 1024) // bytes_per_row)
    tn = min(n, block_n, vmem_cap_rows)
    if n >= 64:
        # v7x has 2 TensorCores: force >= 2 grid steps so dimension_semantics=("parallel",)
        # actually spreads work across them (no effect on v5e/v6e's single TC).
        tn = min(tn, _round_up(pl.cdiv(n, 2), 8))
    if tn < n:
        # Tiled case: keep the block's sublane dim a multiple of 8.
        tn = max(8, (tn // 8) * 8)
    return tn


@functools.partial(jax.jit, static_argnames=("block_n",))
def generator_cnn_forward(x, weight, *, block_n=1024):
    """Forward pass of GeneratorCNN: y = Conv1d(x), padding=1, no bias.

    x:      (N, C_in, L)       float32
    weight: (C_out, C_in, 3)   float32
    returns (N, C_out, L)      float32
    """
    n, c_in, length = x.shape
    c_out = weight.shape[0]
    w_flat = weight.reshape(-1).astype(jnp.float32)

    # CNL layout: batch rows on the sublane axis, length dense on lanes.  For the default
    # c_in == 1 this transpose is a free reshape; for multi-channel it is one small XLA
    # transpose outside the single HBM pass made by the kernel.
    x_cnl = jnp.transpose(x, (1, 0, 2))

    tn = _choose_batch_tile(n, block_n, c_in, c_out, length)
    grid = (pl.cdiv(n, tn),)

    itemsize = jnp.dtype(x.dtype).itemsize
    flops = 2 * n * c_out * c_in * KERNEL_SIZE * length
    bytes_accessed = (x.size + n * c_out * length) * itemsize + w_flat.size * 4

    out_cnl = pl.pallas_call(
        conv1d_same_kernel,
        out_shape=jax.ShapeDtypeStruct((c_out, n, length), x.dtype),
        grid=grid,
        in_specs=[
            pl.BlockSpec((c_in, tn, length), lambda i: (0, i, 0),
                         memory_space=pltpu.MemorySpace.VMEM),
            pl.BlockSpec(memory_space=pltpu.MemorySpace.SMEM),   # tiny flat weight table
        ],
        out_specs=pl.BlockSpec((c_out, tn, length), lambda i: (0, i, 0),
                               memory_space=pltpu.MemorySpace.VMEM),
        compiler_params=pltpu.CompilerParams(
            dimension_semantics=("parallel",),      # batch tiles shard across v7x's 2 TCs
            vmem_limit_bytes=48 * 1024 * 1024,      # inside v7x's 64 MiB physical VMEM
        ),
        cost_estimate=pl.CostEstimate(
            flops=flops, transcendentals=0, bytes_accessed=bytes_accessed),
    )(x_cnl, w_flat)

    return jnp.transpose(out_cnl, (1, 0, 2))


def init_params(key, input_dim=1, output_dim=1):
    """Deterministic init mimicking PyTorch Conv1d default (uniform in +/- 1/sqrt(fan_in))."""
    fan_in = input_dim * KERNEL_SIZE
    bound = 1.0 / jnp.sqrt(jnp.float32(fan_in))
    weight = jax.random.uniform(
        key, (output_dim, input_dim, KERNEL_SIZE),
        minval=-bound, maxval=bound, dtype=jnp.float32)
    return weight


def reference_conv1d(x, w):
    # Same semantics as torch.nn.Conv1d (NCW layout, stride 1, padding 1, no bias).
    return jax.lax.conv_general_dilated(
        x, w, window_strides=(1,), padding=((1, 1),),
        dimension_numbers=("NCH", "OIH", "NCH"))


if __name__ == "__main__":
    key = jax.random.PRNGKey(0)

    configs = [
        # (batch, c_in, c_out, seq, block_n)
        (2, 1, 1, 128, 1024),    # module defaults (input_dim=output_dim=1), single tile
        (6, 4, 3, 128, 1024),    # multi-channel; co-outer / ci-inner channel loops
        (200, 1, 1, 128, 1024),  # tiled parallel batch grid + in-kernel chunk loop + partial tile
    ]

    for idx, (batch, c_in, c_out, seq, block_n) in enumerate(configs):
        key, k_w, k_x = jax.random.split(key, 3)
        weight = init_params(k_w, input_dim=c_in, output_dim=c_out)
        x = jax.random.normal(k_x, (batch, c_in, seq), dtype=jnp.float32)

        y = jax.block_until_ready(generator_cnn_forward(x, weight, block_n=block_n))

        y_ref = reference_conv1d(x, weight)
        assert y.shape == (batch, c_out, seq)
        assert jnp.allclose(y, y_ref, atol=1e-5, rtol=1e-5), \
            f"mismatch vs reference conv (config {idx})"

    print("KERNEL_OK")
</pallas_src>

<mosaic_0001>
module attributes {stable_mosaic.version = 11 : i64} {
  func.func @conv1d_same_kernel(%arg0: i32, %arg1: memref<1x2x128xf32, #tpu.memory_space<vmem>>, %arg2: memref<3xf32, #tpu.memory_space<smem>>, %arg3: memref<1x2x128xf32, #tpu.memory_space<vmem>>) attributes {dimension_semantics = [#tpu.dimension_semantics<parallel>], iteration_bounds = array<i64: 1>, scalar_prefetch = 0 : i64, scratch_operands = 0 : i64, tpu.core_type = #tpu.core_type<tc>, window_params = [{transform_indices = @transform_0, window_bounds = array<i64: 1, 2, 128>}, {transform_indices = @transform_1, window_bounds = array<i64: 3>}, {transform_indices = @transform_2, window_bounds = array<i64: 1, 2, 128>}]} {
    %0 = tpu.iota {dimensions = array<i32: 1>} : vector<1x128xi32>
    %c0_i32 = arith.constant 0 : i32
    %1 = vector.broadcast %c0_i32 : i32 to vector<1x128xi32>
    %2 = arith.cmpi sgt, %0, %1 : vector<1x128xi32>
    %c127_i32 = arith.constant 127 : i32
    %3 = vector.broadcast %c127_i32 : i32 to vector<1x128xi32>
    %4 = arith.cmpi slt, %0, %3 : vector<1x128xi32>
    %cst = arith.constant 0.000000e+00 : f32
    %5 = vector.broadcast %cst : f32 to vector<2x128xf32>
    %c0 = arith.constant 0 : index
    %c0_0 = arith.constant 0 : index
    %c0_1 = arith.constant 0 : index
    %6 = vector.load %arg1[%c0, %c0_0, %c0_1] : memref<1x2x128xf32, #tpu.memory_space<vmem>>, vector<1x2x128xf32>
    %7 = vector.shape_cast %6 : vector<1x2x128xf32> to vector<2x128xf32>
    %c1_i32 = arith.constant 1 : i32
    %8 = tpu.dynamic_rotate %7 by %c1_i32 dim 1 : vector<2x128xf32>, i32 -> vector<2x128xf32>
    %cst_2 = arith.constant 0.000000e+00 : f32
    %9 = vector.shape_cast %2 : vector<1x128xi1> to vector<1x128xi1>
    %10 = vector.broadcast %9 : vector<1x128xi1> to vector<2x128xi1>
    %11 = vector.broadcast %cst_2 : f32 to vector<2x128xf32>
    %12 = arith.select %10, %8, %11 : vector<2x128xi1>, vector<2x128xf32>
    %c127_i32_3 = arith.constant 127 : i32
    %13 = tpu.dynamic_rotate %7 by %c127_i32_3 dim 1 : vector<2x128xf32>, i32 -> vector<2x128xf32>
    %cst_4 = arith.constant 0.000000e+00 : f32
    %14 = vector.shape_cast %4 : vector<1x128xi1> to vector<1x128xi1>
    %15 = vector.broadcast %14 : vector<1x128xi1> to vector<2x128xi1>
    %16 = vector.broadcast %cst_4 : f32 to vector<2x128xf32>
    %17 = arith.select %15, %13, %16 : vector<2x128xi1>, vector<2x128xf32>
    %c0_5 = arith.constant 0 : index
    %18 = memref.load %arg2[%c0_5] : memref<3xf32, #tpu.memory_space<smem>>
    %19 = vector.broadcast %18 : f32 to vector<2x128xf32>
    %20 = arith.mulf %19, %12 : vector<2x128xf32>
    %c1 = arith.constant 1 : index
    %21 = memref.load %arg2[%c1] : memref<3xf32, #tpu.memory_space<smem>>
    %22 = vector.broadcast %21 : f32 to vector<2x128xf32>
    %23 = arith.mulf %22, %7 : vector<2x128xf32>
    %24 = arith.addf %20, %23 : vector<2x128xf32>
    %c2 = arith.constant 2 : index
    %25 = memref.load %arg2[%c2] : memref<3xf32, #tpu.memory_space<smem>>
    %26 = vector.broadcast %25 : f32 to vector<2x128xf32>
    %27 = arith.mulf %26, %17 : vector<2x128xf32>
    %28 = arith.addf %24, %27 : vector<2x128xf32>
    %29 = arith.addf %5, %28 : vector<2x128xf32>
    %c0_6 = arith.constant 0 : index
    %c0_7 = arith.constant 0 : index
    %c0_8 = arith.constant 0 : index
    %30 = vector.load %arg3[%c0_6, %c0_7, %c0_8] : memref<1x2x128xf32, #tpu.memory_space<vmem>>, vector<1x2x128xf32>
    %31 = vector.shape_cast %30 : vector<1x2x128xf32> to vector<2x128xf32>
    %32 = vector.shape_cast %29 : vector<2x128xf32> to vector<1x2x128xf32>
    tpu.vector_store %arg3[%c0_6, %c0_7, %c0_8], %32 {strides = array<i32>} : memref<1x2x128xf32, #tpu.memory_space<vmem>>, vector<1x2x128xf32>,
    return
  }
  func.func @transform_0(%arg0: i32) -> (i32, i32, i32) {
    %c0_i32 = arith.constant 0 : i32
    %c0_i32_0 = arith.constant 0 : i32
    %c0_i32_1 = arith.constant 0 : i32
    return %c0_i32, %arg0, %c0_i32_0 : i32, i32, i32
  }
  func.func @transform_1(%arg0: i32) -> i32 {
    %c0_i32 = arith.constant 0 : i32
    %c0_i32_0 = arith.constant 0 : i32
    return %c0_i32 : i32
  }
  func.func @transform_2(%arg0: i32) -> (i32, i32, i32) {
    %c0_i32 = arith.constant 0 : i32
    %c0_i32_0 = arith.constant 0 : i32
    %c0_i32_1 = arith.constant 0 : i32
    return %c0_i32, %arg0, %c0_i32_0 : i32, i32, i32
  }
}

</mosaic_0001>

<bundles_post_ra>
// kernel: generator_cnn_forward.1
= control target key start
LH: loop header
LB: loop body
LE: loop exit
PB: predicated region body
PF: predicated region fallthrough
CT: control target
= control target key end

     0   :  { %7 = vsyncpa [#allocation4], 0  ;;  %s149_s0 = inlined_call_operand.vmem [shape: f32[1,2,128], index: 0, kind: input, shape index: {}]   ;;  %s150_s1 = inlined_call_operand.vmem [shape: f32[3], index: 1, kind: input, shape index: {}]   ;;  %s151_s2 = inlined_call_operand.hbm [shape: f32[1,2,128], index: 2, kind: output, shape index: {}]  }
   0x1   :  { %8 = vsyncpa [#allocation3], 0  ;;  %s17_s11 = sshll.u32 %s150_s1, 4  ;;  %s18_s11 = int_to_ptr.vmem [resolvable:$true] %s17_s11 }
   0x2   :  { %s74_s12 = scalar_lea.vmem %s18_s11, 16  ;;  %p79_p1 = scmp.lt.s32.totalorder %s18_s11, %s18_s11 }
   0x3   :  { %p75_p0 = scmp.ne.s32.totalorder %s18_s11, %s74_s12  ;;  %p80_p2 = scmp.lt.s32.totalorder %s74_s12, %s74_s12 }
   0x5   :  { %p81_p3 = por %p80_p2, %p79_p1 }
   0x7   :  { %p82_p4 = pnand %p81_p3, %p75_p0 }
   0x9   :  { %85 = shalt.err (!%p82_p4)
}
   0xa   :  { %s112_s13 = smov [#allocation2]  }
   0xb   :  { %20 = dma.vmem_to_smem %s18_s11, 16, %s112_s13, [#allocation4]  }
   0xc   :  { %108 = dma.done.wait [#allocation4], 16  }
   0xd   :  { %109 = vsyncadd [#allocation4], 4294967280 }
   0xe   :  { %24 = sfence }
   0xf   :  { %v29_v0 = vld [vmem:[%s149_s0] sm:$0x3]  ;;  %s113_s16 = smov 1   ;;  %s114_s1 = smov 127   ;;  %v25_v1 = vlaneseq }
  0x10   :  { %30 = vrot.lane.b32.xlu0 %v29_v0, %s113_s16  ;;  %s68_s17 = sld [smem:[#allocation2 + $0x1]]  ;;  %s40_s18 = sld [smem:[#allocation2]] }
  0x11   :  { %v26_v2 = vand.u32 127, %v25_v1  ;;  %s69_s19 = sld [smem:[#allocation2 + $0x2]]  ;;  %s115_s0 = smov [#allocation5]  }
  0x12   :  { %s59_s20 = sshll.u32 %s115_s0, 4  ;;  %s60_s20 = int_to_ptr.vmem [resolvable:$true] %s59_s20 }
  0x13   :  { %vm27_vm0 = vcmp.gt.s32.totalorder %v26_v2, 0  ;;  %vm28_vm1 = vcmp.lt.s32.totalorder %v26_v2, 127  ;;  %s86_s21 = scalar_lea.vmem %s60_s20, 32  ;;  %p91_p6 = scmp.lt.s32.totalorder %s60_s20, %s60_s20 }
  0x14   :  { %35 = vrot.lane.b32.xlu0 %v29_v0, %s114_s1  ;;  %p87_p5 = scmp.ne.s32.totalorder %s60_s20, %s86_s21  ;;  %p92_p7 = scmp.lt.s32.totalorder %s86_s21, %s86_s21 }
  0x16   :  { %v44_v3 = vstv %s68_s17  ;;  %v41_v4 = vstv %s40_s18  ;;  %p93_p8 = por %p92_p7, %p91_p6 }
  0x17   :  { %v45_v7 = vmul.f32 %v44_v3, %v29_v0  ;;  %v48_v9 = vstv %s69_s19 }
  0x18   :  { %p94_p9 = pnand %p93_p8, %p87_p5 }
  0x82   :  { %v31_v5 = vpop.permute.xlu0 %30 }
  0x83   :  { %v34_v6 = vsel %vm27_vm0, %v31_v5, 0.0 }
  0x84   :  { %v42_v8 = vmul.f32 %v41_v4, %v34_v6 }
  0x86   :  { %v36_v10 = vpop.permute.xlu0 %35  ;;  %v46_v13 = vadd.f32 %v45_v7, %v42_v8 }
  0x87   :  { %v39_v11 = vsel %vm28_vm1, %v36_v10, 0.0 }
  0x88   :  { %v49_v12 = vmul.f32 %v48_v9, %v39_v11 }
  0x8a   :  { %v50_v14 = vadd.f32 %v49_v12, %v46_v13 }
  0x8c   :  { %52 = vst [vmem:[#allocation5] sm:$0x3] %v50_v14 }
  0x8d   :  { %97 = shalt.err (!%p94_p9)
}
  0x8e   :  { %s98_s24 = scalar_lea.hbm %s151_s2, 32 }
  0x8f   :  { %p99_p10 = scmp.ne.s32.totalorder %s151_s2, %s98_s24  ;;  %p102_p11 = scmp.lt.u32.totalorder %s98_s24, %s151_s2 }
  0x91   :  { %p104_p12 = pnand %p102_p11, %p99_p10 }
  0x93   :  { %107 = shalt.err (!%p104_p12)
}
  0x94   :  { %62 = dma.vmem_to_hbm [thread:$0]  %s60_s20, 32, %s151_s2, [#allocation3]  }
  0x95   :  { %110 = dma.done.wait [#allocation3], 32  }
  0x96   :  { %111 = vsyncadd [#allocation3], 4294967264 }
  0x97   :  { %66 = vsyncpa [#allocation3], 1 }
  0x98   :  { %67 = vsyncpa [#allocation4], 1 }

</bundles_post_ra>
